<compile_context>
chip_gen: v7x
topology: tpu7x:2x2x1
jax: 0.10.0
libtpu: 0.0.40
codegen_flags: <defaults>
</compile_context>

<pallas_src>
import functools

import jax
import jax.numpy as jnp
from jax.experimental import pallas as pl
from jax.experimental.pallas import tpu as pltpu


def _node_decoder_kernel(x_ref, wt_ref, b_ref, o_ref):
    # x_ref:  (TM, D)   tile of node embeddings
    # wt_ref: (D, F)    transposed weight (grid-constant, VMEM-resident)
    # b_ref:  (1, F)    bias row          (grid-constant, VMEM-resident)
    # o_ref:  (TM, F)   output tile at the true feature width (no lane padding)
    y = jnp.dot(x_ref[...], wt_ref[...], preferred_element_type=jnp.float32)
    y = y + b_ref[...]
    o_ref[...] = jnp.maximum(y, 0.0).astype(o_ref.dtype)


def prepare_params(weight, bias):
    """One-time parameter prep: nn.Linear weight (F, D) -> (D, F), bias -> (1, F)."""
    wt = jnp.asarray(weight, jnp.float32).T            # (D, F)
    b = jnp.asarray(bias, jnp.float32).reshape(1, -1)  # (1, F)
    return wt, b


def _choose_tm(n, target=2048):
    # Largest node tile that comfortably double-buffers in VMEM on all of
    # v5e/v6e/v7x. With the unpadded F=32 output, TM=2048 f32 tiles are
    # ~0.25 MiB each — VMEM is a non-issue; bigger tiles amortize the
    # ~0.35 us per-grid-step overhead and give larger, more efficient DMAs.
    if n <= target:
        return n          # full array dim -> exempt from the (8,128) rule
    return target         # multiple of 8; partial last block handled by Pallas


@functools.partial(jax.jit, static_argnames=("tm",))
def node_decoder_forward(x, wt, b, *, tm=None):
    """x: (N, D) f32; wt: (D, F) f32 prepared; b: (1, F) f32 prepared."""
    n, d = x.shape
    f = wt.shape[1]
    if tm is None:
        tm = _choose_tm(n)
    grid = (pl.cdiv(n, tm),)

    return pl.pallas_call(
        _node_decoder_kernel,
        out_shape=jax.ShapeDtypeStruct((n, f), jnp.float32),
        grid=grid,
        in_specs=[
            pl.BlockSpec((tm, d), lambda i: (i, 0)),   # x: tiled over N
            pl.BlockSpec((d, f), lambda i: (0, 0)),    # wt: VMEM-resident
            pl.BlockSpec((1, f), lambda i: (0, 0)),    # bias: VMEM-resident
        ],
        out_specs=pl.BlockSpec((tm, f), lambda i: (i, 0)),
        compiler_params=pltpu.CompilerParams(
            dimension_semantics=("parallel",),         # shard N across TCs
        ),
        cost_estimate=pl.CostEstimate(                 # real F, not padded
            flops=2 * n * d * f,
            transcendentals=0,
            bytes_accessed=4 * (n * d + d * f + n * f + f),
        ),
    )(x, wt, b)


if __name__ == "__main__":
    # Module config: num_nodes=8, node_feature_dim=32, dim=2
    num_nodes = 8
    dim = 2
    node_feature_dim = 32

    key = jax.random.PRNGKey(0)
    kx, kw, kb = jax.random.split(key, 3)

    # Input: (num_nodes, dim), as nn.Linear(dim, node_feature_dim) implies.
    x = jax.random.normal(kx, (num_nodes, dim), dtype=jnp.float32)

    # Deterministic synthetic parameters (nn.Linear shapes: W (F, D), b (F,)).
    bound = 1.0 / jnp.sqrt(dim)
    weight = jax.random.uniform(kw, (node_feature_dim, dim),
                                minval=-bound, maxval=bound,
                                dtype=jnp.float32)
    bias = jax.random.uniform(kb, (node_feature_dim,),
                              minval=-bound, maxval=bound,
                              dtype=jnp.float32)

    # One-time parameter preparation (transpose only, no padding).
    wt, b2 = prepare_params(weight, bias)

    # Shipped tiny config.
    out = jax.block_until_ready(node_decoder_forward(x, wt, b2))
    ref = jnp.maximum(x @ weight.T + bias, 0.0)
    assert out.shape == (num_nodes, node_feature_dim)
    assert jnp.allclose(out, ref, atol=1e-5, rtol=1e-5)

    # Ragged-tile check: N not a multiple of TM (grid > 1, partial last block).
    n2 = 20
    x2 = jax.random.normal(jax.random.PRNGKey(1), (n2, dim), dtype=jnp.float32)
    out2 = jax.block_until_ready(node_decoder_forward(x2, wt, b2, tm=8))
    ref2 = jnp.maximum(x2 @ weight.T + bias, 0.0)
    assert out2.shape == (n2, node_feature_dim)
    assert jnp.allclose(out2, ref2, atol=1e-5, rtol=1e-5)

    print("KERNEL_OK")
</pallas_src>

<mosaic_0001>
module attributes {stable_mosaic.version = 11 : i64} {
  func.func @_node_decoder_kernel(%arg0: i32, %arg1: memref<8x2xf32, #tpu.memory_space<vmem>>, %arg2: memref<2x32xf32, #tpu.memory_space<vmem>>, %arg3: memref<1x32xf32, #tpu.memory_space<vmem>>, %arg4: memref<8x32xf32, #tpu.memory_space<vmem>>) attributes {dimension_semantics = [#tpu.dimension_semantics<parallel>], iteration_bounds = array<i64: 1>, scalar_prefetch = 0 : i64, scratch_operands = 0 : i64, tpu.core_type = #tpu.core_type<tc>, window_params = [{transform_indices = @transform_0, window_bounds = array<i64: 8, 2>}, {pipeline_mode = #tpu.pipeline_mode<synchronous>, transform_indices = @transform_1, window_bounds = array<i64: 2, 32>}, {pipeline_mode = #tpu.pipeline_mode<synchronous>, transform_indices = @transform_2, window_bounds = array<i64: 1, 32>}, {transform_indices = @transform_3, window_bounds = array<i64: 8, 32>}]} {
    %c0 = arith.constant 0 : index
    %c0_0 = arith.constant 0 : index
    %0 = vector.load %arg1[%c0, %c0_0] : memref<8x2xf32, #tpu.memory_space<vmem>>, vector<8x2xf32>
    %c0_1 = arith.constant 0 : index
    %c0_2 = arith.constant 0 : index
    %1 = vector.load %arg2[%c0_1, %c0_2] : memref<2x32xf32, #tpu.memory_space<vmem>>, vector<2x32xf32>
    %cst = arith.constant dense<0.000000e+00> : vector<8x32xf32>
    %2 = tpu.matmul %0, %1, %cst {dimension_numbers = #tpu.dot_dimension_numbers<[1], [0], [0], [1], [0, 0, 1, 1], [], []>} : vector<8x2xf32>, vector<2x32xf32>, vector<8x32xf32> -> vector<8x32xf32>
    %c0_3 = arith.constant 0 : index
    %c0_4 = arith.constant 0 : index
    %3 = vector.load %arg3[%c0_3, %c0_4] : memref<1x32xf32, #tpu.memory_space<vmem>>, vector<1x32xf32>
    %4 = vector.broadcast %3 : vector<1x32xf32> to vector<8x32xf32>
    %5 = arith.addf %2, %4 : vector<8x32xf32>
    %cst_5 = arith.constant 0.000000e+00 : f32
    %6 = vector.broadcast %cst_5 : f32 to vector<8x32xf32>
    %7 = arith.maximumf %5, %6 : vector<8x32xf32>
    %c0_6 = arith.constant 0 : index
    %c0_7 = arith.constant 0 : index
    %8 = vector.load %arg4[%c0_6, %c0_7] : memref<8x32xf32, #tpu.memory_space<vmem>>, vector<8x32xf32>
    tpu.vector_store %arg4[%c0_6, %c0_7], %7 {strides = array<i32>} : memref<8x32xf32, #tpu.memory_space<vmem>>, vector<8x32xf32>,
    return
  }
  func.func @transform_0(%arg0: i32) -> (i32, i32) {
    %c0_i32 = arith.constant 0 : i32
    %c0_i32_0 = arith.constant 0 : i32
    return %arg0, %c0_i32 : i32, i32
  }
  func.func @transform_1(%arg0: i32) -> (i32, i32) {
    %c0_i32 = arith.constant 0 : i32
    %c0_i32_0 = arith.constant 0 : i32
    %c0_i32_1 = arith.constant 0 : i32
    return %c0_i32, %c0_i32_0 : i32, i32
  }
  func.func @transform_2(%arg0: i32) -> (i32, i32) {
    %c0_i32 = arith.constant 0 : i32
    %c0_i32_0 = arith.constant 0 : i32
    %c0_i32_1 = arith.constant 0 : i32
    return %c0_i32, %c0_i32_0 : i32, i32
  }
  func.func @transform_3(%arg0: i32) -> (i32, i32) {
    %c0_i32 = arith.constant 0 : i32
    %c0_i32_0 = arith.constant 0 : i32
    return %arg0, %c0_i32 : i32, i32
  }
}

</mosaic_0001>

<bundles_post_ra>
// kernel: node_decoder_forward.1
= control target key start
LH: loop header
LB: loop body
LE: loop exit
PB: predicated region body
PF: predicated region fallthrough
CT: control target
= control target key end

     0   :  { %vm28_vm0 = vcmask 1041408   ;;  %v156_v2 = vmov 0.0   ;;  %vm157_vm1 = vmmov 0   ;;  %vm24_vm2 = vcmask 15360   ;;  %s200_s0 = inlined_call_operand.vmem [shape: f32[8,2], index: 0, kind: input, shape index: {}]   ;;  %s201_s1 = inlined_call_operand.vmem [shape: f32[2,32], index: 1, kind: input, shape index: {}]   ;;  %s202_s2 = inlined_call_operand.vmem [shape: f32[1,32], index: 2, kind: input, shape index: {}]   ;;  %s203_s3 = inlined_call_operand.hbm [shape: f32[8,32], index: 3, kind: output, shape index: {}]  }
   0x1   :  { %v16_v0 = vld [vmem:[%s201_s1] sm:$0x3]  ;;  %124 = vmatprep.subr.mxu0 %v156_v2  ;;  %126 = vmatprep.mubr.msk.f32.mxu0 %vm157_vm1, %v156_v2 }
   0x2   :  { %v15_v1 = vld [vmem:[%s200_s0] sm:$0xff] }
   0x3   :  { %8 = vsyncpa [#allocation3], 0  ;;  %125 = vmatpush3.msk.msra.mxu0 %vm28_vm0, %v16_v0  ;;  %v119_v3 = vld [vmem:[%s202_s2] ss:$0 sm:$0xff]  ;;  %s158_s18 = smov [#allocation2]   ;;  %vm103_vm3 = vcmask 261120  }
   0x4   :  { %127 = vmatmul.mubr.msk.f32.vlgmr.msra.gmra.mrb[0].mxu0 %vm24_vm2, %v15_v1  ;;  %s111_s1 = sshll.u32 %s158_s18, 4  ;;  %s112_s1 = int_to_ptr.vmem [resolvable:$true] %s111_s1 }
   0x5   :  { %s132_s0 = scalar_lea.vmem %s112_s1, 128  ;;  %p137_p1 = scmp.lt.s32.totalorder %s112_s1, %s112_s1 }
   0x6   :  { %p133_p0 = scmp.ne.s32.totalorder %s112_s1, %s132_s0  ;;  %p138_p2 = scmp.lt.s32.totalorder %s132_s0, %s132_s0 }
   0x8   :  { %p139_p3 = por %p138_p2, %p137_p1 }
   0xa   :  { %p140_p4 = pnand %p139_p3, %p133_p0 }
  0xd7   :  { %v98_v4 = vpop.f32.mrb[0].mxu0 }
  0xd8   :  { %v99_v5 = vadd.f32 %v119_v3, %v98_v4  ;;  %v128_v6 = vpop.f32.mrb[1].mxu0 }
  0xda   :  { %v102_v7 = vmax.f32 %v99_v5, 0.0 }
  0xdc   :  { %104 = vst.msk [vmem:[#allocation2] sm:$0xff] %vm103_vm3, %v102_v7 }
  0xdd   :  { %143 = shalt.err (!%p140_p4)
}
  0xde   :  { %s144_s2 = scalar_lea.hbm %s203_s3, 128 }
  0xdf   :  { %p145_p5 = scmp.ne.s32.totalorder %s203_s3, %s144_s2  ;;  %p148_p6 = scmp.lt.u32.totalorder %s144_s2, %s203_s3 }
  0xe1   :  { %p150_p7 = pnand %p148_p6, %p145_p5 }
  0xe3   :  { %153 = shalt.err (!%p150_p7)
}
  0xe4   :  { %114 = dma.vmem_to_hbm [thread:$0]  %s112_s1, 128, %s203_s3, [#allocation3]  }
  0xe5   :  { %154 = dma.done.wait [#allocation3], 128  }
  0xe6   :  { %155 = vsyncadd [#allocation3], 4294967168 }
  0xe7   :  { %118 = vsyncpa [#allocation3], 1 }

</bundles_post_ra>
